<compile_context>
chip_gen: v7x
topology: tpu7x:2x2x1
jax: 0.10.0
libtpu: 0.0.40
codegen_flags: <defaults>
</compile_context>

<pallas_src>
import jax
import jax.numpy as jnp
from jax import lax
from jax.experimental import pallas as pl
from jax.experimental.pallas import tpu as pltpu

VMEM_LIMIT = 48 * 1024 * 1024  # explicit scoped-VMEM budget (fits v5e/v6e/v7x)


def _pick_tile(dim, target, quantum):
    """Largest multiple of `quantum` <= target that divides dim, else the full dim."""
    t = (min(target, dim) // quantum) * quantum
    while t >= quantum:
        if dim % t == 0:
            return t
        t -= quantum
    return dim


def _pick_batch_tile(b, target=8):
    """Batch tile that is either the full batch or a multiple of 8 dividing it."""
    if b <= target:
        return b
    t = (target // 8) * 8
    while t >= 8:
        if b % t == 0:
            return t
        t -= 8
    return b


# --------------------------------------------------------------------------
# GRU input projection (hoisted out of the recurrence), both directions fused:
#   gi = concat(xs, -1) @ W_ih_cat + b_fold,  W_ih_cat : (Din, 6H)
# Output is gate-separated: (2 dirs, 3 gates, T*B, H) in bf16, so the recurrence
# loop never slices the lane axis.
# --------------------------------------------------------------------------
def _make_inproj_kernel(n_in, h_dim):
    def kernel(*args):
        x_refs = args[:n_in]
        w_refs = args[n_in:2 * n_in]
        b_ref = args[2 * n_in]
        o_ref = args[2 * n_in + 1]
        acc = jnp.dot(x_refs[0][...], w_refs[0][...],
                      preferred_element_type=jnp.float32)
        for xr, wr in zip(x_refs[1:], w_refs[1:]):
            acc = acc + jnp.dot(xr[...], wr[...],
                                preferred_element_type=jnp.float32)
        acc = acc + b_ref[...]
        # Split the 6H columns into per-direction, per-gate slabs ONCE per row
        # tile (outside the recurrence's serial time loop).
        for d in range(2):
            for g in range(3):
                col = (3 * d + g) * h_dim
                o_ref[d, g] = acc[:, col:col + h_dim].astype(o_ref.dtype)
    return kernel


def gru_input_proj(xs, w_parts, b_fold, tm_target=512):
    # xs: list of (M, Hi) bf16 slabs (fwd/bwd of previous layer, never concatenated)
    # w_parts: matching list of (Hi, 6H) bf16 row blocks of the stacked weight
    # b_fold: (1, 6H) f32 (b_ih with the r/z hidden biases folded in)
    n_in = len(xs)
    m = xs[0].shape[0]
    g6 = b_fold.shape[-1]
    h = g6 // 6
    tm = _pick_tile(m, tm_target, 8)

    in_specs = [pl.BlockSpec((tm, x.shape[1]), lambda i: (i, 0)) for x in xs]
    in_specs += [pl.BlockSpec(w.shape, lambda i: (0, 0)) for w in w_parts]
    in_specs.append(pl.BlockSpec((1, g6), lambda i: (0, 0)))

    return pl.pallas_call(
        _make_inproj_kernel(n_in, h),
        out_shape=jax.ShapeDtypeStruct((2, 3, m, h), jnp.bfloat16),
        grid=(m // tm,),
        in_specs=in_specs,
        out_specs=pl.BlockSpec((2, 3, tm, h), lambda i: (0, 0, i, 0)),
        compiler_params=pltpu.CompilerParams(
            dimension_semantics=("parallel",),
            vmem_limit_bytes=VMEM_LIMIT),
    )(*xs, *w_parts, b_fold)


# --------------------------------------------------------------------------
# GRU recurrence: both directions fused into one in-kernel (unrolled) time loop.
# The grid chunks the time axis ("arbitrary"), so only one gi/ht chunk per
# direction is VMEM-resident at a time; the carried hidden state lives in the
# resident hn output block.  The backward direction reads its gi chunks in
# reverse grid order via the index_map (no jnp.flip HBM passes).
# --------------------------------------------------------------------------
def _gru_recurrence_kernel(gi_f_ref, gi_b_ref, h0_ref, whh_ref, bhn_ref,
                           ht0_ref, ht1_ref, hn_ref):
    c = pl.program_id(0)
    tc = ht0_ref.shape[0]
    _, b, h = h0_ref.shape

    @pl.when(c == 0)
    def _():
        hn_ref[...] = h0_ref[...]

    # Loop-invariant: per-gate recurrent weights and the hoisted n-gate bias.
    wf_r = whh_ref[0, 0]
    wf_z = whh_ref[0, 1]
    wf_n = whh_ref[0, 2]
    wb_r = whh_ref[1, 0]
    wb_z = whh_ref[1, 1]
    wb_n = whh_ref[1, 2]
    bhn_f = jnp.broadcast_to(bhn_ref[0], (b, h))
    bhn_b = jnp.broadcast_to(bhn_ref[1], (b, h))

    def step(i, carry):
        h_f, h_b = carry
        j = tc - 1 - i
        hf16 = h_f.astype(jnp.bfloat16)
        hb16 = h_b.astype(jnp.bfloat16)

        # forward direction (global time c*tc + i)
        gh_r = jnp.dot(hf16, wf_r, preferred_element_type=jnp.float32)
        gh_z = jnp.dot(hf16, wf_z, preferred_element_type=jnp.float32)
        gh_n = jnp.dot(hf16, wf_n, preferred_element_type=jnp.float32)
        r = jax.nn.sigmoid(gi_f_ref[0, 0, i].astype(jnp.float32) + gh_r)
        z = jax.nn.sigmoid(gi_f_ref[0, 1, i].astype(jnp.float32) + gh_z)
        n = jnp.tanh(gi_f_ref[0, 2, i].astype(jnp.float32) + r * (gh_n + bhn_f))
        h_f_new = (1.0 - z) * n + z * h_f
        ht0_ref[i] = h_f_new.astype(jnp.bfloat16)

        # backward direction (global time T-1 - (c*tc + i))
        gb_r = jnp.dot(hb16, wb_r, preferred_element_type=jnp.float32)
        gb_z = jnp.dot(hb16, wb_z, preferred_element_type=jnp.float32)
        gb_n = jnp.dot(hb16, wb_n, preferred_element_type=jnp.float32)
        rb = jax.nn.sigmoid(gi_b_ref[0, 0, j].astype(jnp.float32) + gb_r)
        zb = jax.nn.sigmoid(gi_b_ref[0, 1, j].astype(jnp.float32) + gb_z)
        nb = jnp.tanh(gi_b_ref[0, 2, j].astype(jnp.float32) + rb * (gb_n + bhn_b))
        h_b_new = (1.0 - zb) * nb + zb * h_b
        ht1_ref[j] = h_b_new.astype(jnp.bfloat16)

        return (h_f_new, h_b_new)

    h_f_fin, h_b_fin = lax.fori_loop(0, tc, step, (hn_ref[0], hn_ref[1]),
                                     unroll=True)
    hn_ref[0] = h_f_fin
    hn_ref[1] = h_b_fin


def gru_recurrence(gi, h0, w_hh, b_hn, tc_target=16):
    # gi: (2, 3, T, B, H) bf16; h0: (2, B, H) f32; w_hh: (2, 3, H, H) bf16;
    # b_hn: (2, 1, H) f32
    _, _, t, b, h = gi.shape
    tc = _pick_tile(t, tc_target, 1)
    nchunks = t // tc

    ht0, ht1, hn = pl.pallas_call(
        _gru_recurrence_kernel,
        out_shape=(jax.ShapeDtypeStruct((t, b, h), jnp.bfloat16),
                   jax.ShapeDtypeStruct((t, b, h), jnp.bfloat16),
                   jax.ShapeDtypeStruct((2, b, h), jnp.float32)),
        grid=(nchunks,),
        in_specs=[
            pl.BlockSpec((1, 3, tc, b, h), lambda c: (0, 0, c, 0, 0)),
            pl.BlockSpec((1, 3, tc, b, h),
                         lambda c: (1, 0, nchunks - 1 - c, 0, 0)),
            pl.BlockSpec((2, b, h), lambda c: (0, 0, 0)),
            pl.BlockSpec((2, 3, h, h), lambda c: (0, 0, 0, 0)),
            pl.BlockSpec((2, 1, h), lambda c: (0, 0, 0)),
        ],
        out_specs=(
            pl.BlockSpec((tc, b, h), lambda c: (c, 0, 0)),
            pl.BlockSpec((tc, b, h), lambda c: (nchunks - 1 - c, 0, 0)),
            pl.BlockSpec((2, b, h), lambda c: (0, 0, 0)),
        ),
        compiler_params=pltpu.CompilerParams(
            dimension_semantics=("arbitrary",),
            vmem_limit_bytes=VMEM_LIMIT),
    )(gi, gi, h0, w_hh, b_hn)
    return ht0, ht1, hn


# --------------------------------------------------------------------------
# Attention: whole batch tile per grid step, batched einsums (batch-major inside),
# fwd/bwd ht consumed as separate slabs against pre-split W_a / W_c halves.
# Output is scattered into time-major (T, B, 4H) bf16 so the output projection
# needs no transpose afterwards.
# --------------------------------------------------------------------------
def _attention_kernel(ht0_ref, ht1_ref, hs_ref, wa0_ref, wa1_ref,
                      wcc_ref, wch0_ref, wch1_ref, b_ref, o_ref):
    bb, t, h = ht0_ref.shape
    s = hs_ref.shape[1]
    k2 = hs_ref.shape[2]
    f = o_ref.shape[2]

    hs = hs_ref[...]                                   # (bb, S, 2H) bf16
    ht0 = ht0_ref[...]                                 # (bb, T, H)  bf16
    ht1 = ht1_ref[...]

    hs2d = hs.reshape(bb * s, k2)
    hsw0 = jnp.dot(hs2d, wa0_ref[...],
                   preferred_element_type=jnp.float32).reshape(bb, s, h)
    hsw1 = jnp.dot(hs2d, wa1_ref[...],
                   preferred_element_type=jnp.float32).reshape(bb, s, h)
    hsw0 = hsw0.astype(jnp.bfloat16)
    hsw1 = hsw1.astype(jnp.bfloat16)

    score = (jnp.einsum('bth,bsh->bts', ht0, hsw0,
                        preferred_element_type=jnp.float32)
             + jnp.einsum('bth,bsh->bts', ht1, hsw1,
                          preferred_element_type=jnp.float32))     # (bb, T, S)
    score = score - jnp.max(score, axis=-1, keepdims=True)
    p = jnp.exp(score)
    a = p * pl.reciprocal(jnp.sum(p, axis=-1, keepdims=True), approx=True)

    c = jnp.einsum('bts,bsk->btk', a.astype(jnp.bfloat16), hs,
                   preferred_element_type=jnp.float32)              # (bb, T, 2H)

    pre = (jnp.dot(c.reshape(bb * t, k2).astype(jnp.bfloat16), wcc_ref[...],
                   preferred_element_type=jnp.float32)
           + jnp.dot(ht0.reshape(bb * t, h), wch0_ref[...],
                     preferred_element_type=jnp.float32)
           + jnp.dot(ht1.reshape(bb * t, h), wch1_ref[...],
                     preferred_element_type=jnp.float32)
           + b_ref[...])
    out = jnp.tanh(pre).astype(o_ref.dtype).reshape(bb, t, f)

    # batch -> time-major scatter (static, tiny loop over the batch tile)
    for j in range(bb):
        o_ref[:, j, :] = out[j]


def attention_pallas(ht0_b, ht1_b, hs_b, wa0, wa1, wcc, wch0, wch1, b_a,
                     bb_target=8):
    bsz, t, h = ht0_b.shape
    s = hs_b.shape[1]
    k2 = hs_b.shape[2]
    f = wcc.shape[-1]
    bb = _pick_batch_tile(bsz, bb_target)
    return pl.pallas_call(
        _attention_kernel,
        out_shape=jax.ShapeDtypeStruct((t, bsz, f), jnp.bfloat16),
        grid=(bsz // bb,),
        in_specs=[
            pl.BlockSpec((bb, t, h), lambda i: (i, 0, 0)),
            pl.BlockSpec((bb, t, h), lambda i: (i, 0, 0)),
            pl.BlockSpec((bb, s, k2), lambda i: (i, 0, 0)),
            pl.BlockSpec((k2, h), lambda i: (0, 0)),
            pl.BlockSpec((k2, h), lambda i: (0, 0)),
            pl.BlockSpec((k2, f), lambda i: (0, 0)),
            pl.BlockSpec((h, f), lambda i: (0, 0)),
            pl.BlockSpec((h, f), lambda i: (0, 0)),
            pl.BlockSpec((1, f), lambda i: (0, 0)),
        ],
        out_specs=pl.BlockSpec((t, bb, f), lambda i: (0, i, 0)),
        compiler_params=pltpu.CompilerParams(
            dimension_semantics=("parallel",),
            vmem_limit_bytes=VMEM_LIMIT),
    )(ht0_b, ht1_b, hs_b, wa0, wa1, wcc, wch0, wch1, b_a)


# --------------------------------------------------------------------------
# Output projection: y = x @ W + b, lane-dense (tm, tn) tiles.
# --------------------------------------------------------------------------
def _linear_kernel(x_ref, w_ref, b_ref, o_ref):
    o_ref[...] = (jnp.dot(x_ref[...], w_ref[...],
                          preferred_element_type=jnp.float32) + b_ref[...])


def linear_pallas(x2d, w, b, tm_target=512, tn_target=512):
    m, k = x2d.shape
    n = w.shape[-1]
    tm = _pick_tile(m, tm_target, 8)
    tn = _pick_tile(n, tn_target, 128)
    return pl.pallas_call(
        _linear_kernel,
        out_shape=jax.ShapeDtypeStruct((m, n), jnp.float32),
        grid=(m // tm, n // tn),
        in_specs=[
            pl.BlockSpec((tm, k), lambda i, j: (i, 0)),
            pl.BlockSpec((k, tn), lambda i, j: (0, j)),
            pl.BlockSpec((1, tn), lambda i, j: (0, j)),
        ],
        out_specs=pl.BlockSpec((tm, tn), lambda i, j: (i, j)),
        compiler_params=pltpu.CompilerParams(
            dimension_semantics=("parallel", "parallel"),
            vmem_limit_bytes=VMEM_LIMIT),
    )(x2d, w, b)


# --------------------------------------------------------------------------
# Decoder forward (Pallas version)
# --------------------------------------------------------------------------
def decoder_forward(prep, x_tokens, hs, states):
    # TODO(synk): the nn.Embedding row gather stays in plain JAX; a data-dependent
    # gather of single rows has no clean BlockSpec formulation at this size.
    t, bsz = x_tokens.shape
    h = prep['hidden_dim']
    emb = prep['embedding'][x_tokens].astype(jnp.bfloat16)          # (T, B, H)

    xs = [emb.reshape(t * bsz, h)]
    new_states = []
    ht0 = ht1 = None
    for li in range(prep['num_layers']):
        lp = prep['layers'][li]
        # Pre-split the stacked (Din, 6H) weight into per-slab row blocks so
        # in_specs and inputs match one-to-one (previous pytree-mismatch fix).
        w_parts, off = [], 0
        for xk in xs:
            hi = xk.shape[1]
            w_parts.append(lp['w_ih'][off:off + hi])
            off += hi
        gi = gru_input_proj(xs, w_parts, lp['b_gi'])                # (2,3,T*B,H) bf16
        gi = gi.reshape(2, 3, t, bsz, h)
        h0 = states[2 * li:2 * li + 2]                              # (2, B, H)
        ht0, ht1, hn = gru_recurrence(gi, h0, lp['w_hh'], lp['b_hn'])
        new_states.append(hn)
        # Next layer consumes fwd/bwd halves separately (no (T,B,2H) concat copy).
        xs = [ht0.reshape(t * bsz, h), ht1.reshape(t * bsz, h)]
    new_states = jnp.concatenate(new_states, axis=0)                # (2L, B, H)

    # Batch-major views of the (small) ht/hs tensors for the batched attention;
    # the large tensors downstream (attention output, logits) stay time-major.
    ht0_b = jnp.transpose(ht0, (1, 0, 2))                           # (B, T, H) bf16
    ht1_b = jnp.transpose(ht1, (1, 0, 2))
    hs_b = jnp.transpose(hs, (1, 0, 2)).astype(jnp.bfloat16)        # (B, S, 2H)
    att = attention_pallas(ht0_b, ht1_b, hs_b,
                           prep['W_a0'], prep['W_a1'],
                           prep['W_c_c'], prep['W_c_h0'], prep['W_c_h1'],
                           prep['b_a'])                             # (T, B, 4H) bf16
    f = att.shape[-1]
    y2d = linear_pallas(att.reshape(t * bsz, f), prep['W_out'], prep['b_out'])
    y = y2d.reshape(t, bsz, -1)                                     # (T, B, V), no transpose
    return y, new_states


# --------------------------------------------------------------------------
# Pure-JAX reference (PyTorch Decoder semantics on the same prepared params,
# mirroring the kernels' bf16 MXU / storage casts so the correctness check
# isolates structural and indexing errors).
# --------------------------------------------------------------------------
def decoder_forward_ref(prep, x_tokens, hs, states):
    t, bsz = x_tokens.shape
    h = prep['hidden_dim']
    bf, f32 = jnp.bfloat16, jnp.float32

    x = prep['embedding'][x_tokens].astype(bf)
    xs = [x.reshape(t * bsz, h)]
    new_states = []
    ht0 = ht1 = None
    for li in range(prep['num_layers']):
        lp = prep['layers'][li]
        acc = jnp.zeros((t * bsz, 6 * h), f32)
        off = 0
        for xk in xs:
            hi = xk.shape[1]
            acc = acc + jnp.dot(xk, lp['w_ih'][off:off + hi],
                                preferred_element_type=f32)
            off += hi
        gi = (acc + lp['b_gi']).astype(bf).reshape(t, bsz, 2, 3, h)

        hts = []
        for d in range(2):
            w_r, w_z, w_n = lp['w_hh'][d, 0], lp['w_hh'][d, 1], lp['w_hh'][d, 2]
            bhn = lp['b_hn'][d]

            def cell(hprev, gi_t, w_r=w_r, w_z=w_z, w_n=w_n, bhn=bhn):
                h16 = hprev.astype(bf)
                gh_r = jnp.dot(h16, w_r, preferred_element_type=f32)
                gh_z = jnp.dot(h16, w_z, preferred_element_type=f32)
                gh_n = jnp.dot(h16, w_n, preferred_element_type=f32)
                r = jax.nn.sigmoid(gi_t[:, 0].astype(f32) + gh_r)
                z = jax.nn.sigmoid(gi_t[:, 1].astype(f32) + gh_z)
                n = jnp.tanh(gi_t[:, 2].astype(f32) + r * (gh_n + bhn))
                h_new = (1.0 - z) * n + z * hprev
                return h_new, h_new.astype(bf)

            h_fin, ht_d = lax.scan(cell, states[2 * li + d], gi[:, :, d],
                                   reverse=(d == 1))
            new_states.append(h_fin)
            hts.append(ht_d)
        ht0, ht1 = hts
        xs = [ht0.reshape(t * bsz, h), ht1.reshape(t * bsz, h)]
    new_states = jnp.stack(new_states, axis=0)

    hs16 = hs.astype(bf)
    hsw0 = jnp.einsum('sbk,kh->sbh', hs16, prep['W_a0'],
                      preferred_element_type=f32).astype(bf)
    hsw1 = jnp.einsum('sbk,kh->sbh', hs16, prep['W_a1'],
                      preferred_element_type=f32).astype(bf)
    score = (jnp.einsum('tbh,sbh->tbs', ht0, hsw0, preferred_element_type=f32)
             + jnp.einsum('tbh,sbh->tbs', ht1, hsw1, preferred_element_type=f32))
    score = score - jnp.max(score, axis=-1, keepdims=True)
    p = jnp.exp(score)
    a = p / jnp.sum(p, axis=-1, keepdims=True)
    c = jnp.einsum('tbs,sbk->tbk', a.astype(bf), hs16, preferred_element_type=f32)
    pre = (jnp.einsum('tbk,kf->tbf', c.astype(bf), prep['W_c_c'],
                      preferred_element_type=f32)
           + jnp.einsum('tbh,hf->tbf', ht0, prep['W_c_h0'],
                        preferred_element_type=f32)
           + jnp.einsum('tbh,hf->tbf', ht1, prep['W_c_h1'],
                        preferred_element_type=f32)
           + prep['b_a'])
    att = jnp.tanh(pre).astype(bf)
    y = (jnp.einsum('tbf,fv->tbv', att, prep['W_out'], preferred_element_type=f32)
         + prep['b_out'])
    return y, new_states


# --------------------------------------------------------------------------
# Raw PyTorch-shaped parameters + kernel-layout preparation (weight stacking,
# gate splitting, r/z hidden-bias folding, bf16 casts of MXU-facing weights).
# --------------------------------------------------------------------------
def init_raw_params(key, hidden_dim, output_dim, num_layers):
    h, v, nl = hidden_dim, output_dim, num_layers
    keys = iter(jax.random.split(key, 8 * nl + 8))

    def nrm(shape, scale=0.1):
        return (scale * jax.random.normal(next(keys), shape)).astype(jnp.float32)

    raw = {
        'embedding': nrm((v, h), 1.0),
        'gru': [],
        'W_a': nrm((2 * h, 2 * h)),
        'W_c': nrm((4 * h, 4 * h)),
        'b_attn': jnp.zeros((4 * h,), jnp.float32),
        'W_out': nrm((v, 4 * h)),          # torch nn.Linear weight layout (out, in)
        'b_out': nrm((v,), 0.01),
    }
    for l in range(nl):
        din = h if l == 0 else 2 * h
        layer = []
        for _ in range(2):
            layer.append({
                'w_ih': nrm((3 * h, din)),  # torch GRU layout (3H, Din), gates r|z|n
                'w_hh': nrm((3 * h, h)),
                'b_ih': nrm((3 * h,)),
                'b_hh': nrm((3 * h,)),
            })
        raw['gru'].append(layer)
    return raw


def prepare_params(raw, hidden_dim, num_layers):
    h = hidden_dim
    bf = jnp.bfloat16
    prep = {'hidden_dim': h, 'num_layers': num_layers,
            'embedding': raw['embedding'], 'layers': []}
    for layer in raw['gru']:
        w_ih_cols, b_cols, w_hh_d, b_hn_d = [], [], [], []
        for d in range(2):
            p = layer[d]
            w_ih_cols.append(p['w_ih'].T)                       # (Din, 3H), cols r|z|n
            # fold the r/z hidden biases into the hoisted input-projection bias
            b_cols.append(p['b_ih'] + jnp.concatenate(
                [p['b_hh'][:2 * h], jnp.zeros((h,), jnp.float32)]))
            w_hh_d.append(jnp.stack(
                [p['w_hh'][g * h:(g + 1) * h, :].T for g in range(3)]))
            b_hn_d.append(p['b_hh'][2 * h:3 * h][None, :])      # (1, H)
        prep['layers'].append({
            'w_ih': jnp.concatenate(w_ih_cols, axis=1).astype(bf),   # (Din, 6H)
            'b_gi': jnp.concatenate(b_cols)[None, :],                # (1, 6H)
            'w_hh': jnp.stack(w_hh_d).astype(bf),                    # (2, 3, H, H)
            'b_hn': jnp.stack(b_hn_d),                               # (2, 1, H)
        })
    prep['W_a0'] = raw['W_a'][:, :h].astype(bf)
    prep['W_a1'] = raw['W_a'][:, h:].astype(bf)
    prep['W_c_c'] = raw['W_c'][:2 * h, :].astype(bf)
    prep['W_c_h0'] = raw['W_c'][2 * h:3 * h, :].astype(bf)
    prep['W_c_h1'] = raw['W_c'][3 * h:, :].astype(bf)
    prep['b_a'] = raw['b_attn'][None, :]
    prep['W_out'] = raw['W_out'].T.astype(bf)                        # (4H, V)
    prep['b_out'] = raw['b_out'][None, :]
    return prep


if __name__ == "__main__":
    hidden_dim, output_dim, num_layers = 32, 512, 2
    T, S, B = 8, 10, 4

    key = jax.random.PRNGKey(0)
    kp, kx, khs, kst = jax.random.split(key, 4)
    raw = init_raw_params(kp, hidden_dim, output_dim, num_layers)
    prep = prepare_params(raw, hidden_dim, num_layers)

    x_tokens = jax.random.randint(kx, (T, B), 0, output_dim)          # (T, B) int32
    hs = jax.random.normal(khs, (S, B, 2 * hidden_dim), jnp.float32)  # encoder states
    states = jax.random.normal(kst, (2 * num_layers, B, hidden_dim), jnp.float32)

    y, new_states = decoder_forward(prep, x_tokens, hs, states)
    y = jax.block_until_ready(y)
    new_states = jax.block_until_ready(new_states)

    y_ref, states_ref = decoder_forward_ref(prep, x_tokens, hs, states)
    assert y.shape == (T, B, output_dim)
    assert new_states.shape == (2 * num_layers, B, hidden_dim)
    err_y = float(jnp.max(jnp.abs(y - y_ref)))
    err_s = float(jnp.max(jnp.abs(new_states - states_ref)))
    assert err_y < 2e-2, err_y
    assert err_s < 2e-2, err_s

    print("KERNEL_OK")
</pallas_src>

<mosaic_0001>
module attributes {stable_mosaic.version = 11 : i64} {
  func.func @kernel(%arg0: i32, %arg1: memref<32x32xbf16, #tpu.memory_space<vmem>>, %arg2: memref<32x192xbf16, #tpu.memory_space<vmem>>, %arg3: memref<1x192xf32, #tpu.memory_space<vmem>>, %arg4: memref<2x3x32x32xbf16, #tpu.memory_space<vmem>>) attributes {dimension_semantics = [#tpu.dimension_semantics<parallel>], iteration_bounds = array<i64: 1>, scalar_prefetch = 0 : i64, scratch_operands = 0 : i64, tpu.core_type = #tpu.core_type<tc>, window_params = [{transform_indices = @transform_0, window_bounds = array<i64: 32, 32>}, {pipeline_mode = #tpu.pipeline_mode<synchronous>, transform_indices = @transform_1, window_bounds = array<i64: 32, 192>}, {pipeline_mode = #tpu.pipeline_mode<synchronous>, transform_indices = @transform_2, window_bounds = array<i64: 1, 192>}, {transform_indices = @transform_3, window_bounds = array<i64: 2, 3, 32, 32>}]} {
    %c0 = arith.constant 0 : index
    %c0_0 = arith.constant 0 : index
    %0 = vector.load %arg1[%c0, %c0_0] : memref<32x32xbf16, #tpu.memory_space<vmem>>, vector<32x32xbf16>
    %c0_1 = arith.constant 0 : index
    %c0_2 = arith.constant 0 : index
    %1 = vector.load %arg2[%c0_1, %c0_2] : memref<32x192xbf16, #tpu.memory_space<vmem>>, vector<32x192xbf16>
    %cst = arith.constant dense<0.000000e+00> : vector<32x192xf32>
    %2 = tpu.matmul %0, %1, %cst {dimension_numbers = #tpu.dot_dimension_numbers<[1], [0], [0], [1], [0, 0, 1, 1], [], []>} : vector<32x32xbf16>, vector<32x192xbf16>, vector<32x192xf32> -> vector<32x192xf32>
    %c0_3 = arith.constant 0 : index
    %c0_4 = arith.constant 0 : index
    %3 = vector.load %arg3[%c0_3, %c0_4] : memref<1x192xf32, #tpu.memory_space<vmem>>, vector<1x192xf32>
    %4 = vector.broadcast %3 : vector<1x192xf32> to vector<32x192xf32>
    %5 = arith.addf %2, %4 : vector<32x192xf32>
    %6 = vector.extract_strided_slice %5 {offsets = [0, 0], sizes = [32, 32], strides = [1, 1]} : vector<32x192xf32> to vector<32x32xf32>
    %7 = arith.truncf %6 : vector<32x32xf32> to vector<32x32xbf16>
    %c0_5 = arith.constant 0 : index
    %c0_6 = arith.constant 0 : index
    %c0_7 = arith.constant 0 : index
    %c0_8 = arith.constant 0 : index
    %8 = vector.load %arg4[%c0_5, %c0_6, %c0_7, %c0_8] : memref<2x3x32x32xbf16, #tpu.memory_space<vmem>>, vector<1x1x32x32xbf16>
    %9 = vector.shape_cast %8 : vector<1x1x32x32xbf16> to vector<32x32xbf16>
    %10 = vector.shape_cast %7 : vector<32x32xbf16> to vector<1x1x32x32xbf16>
    tpu.vector_store %arg4[%c0_5, %c0_6, %c0_7, %c0_8], %10 {strides = array<i32>} : memref<2x3x32x32xbf16, #tpu.memory_space<vmem>>, vector<1x1x32x32xbf16>,
    %11 = vector.extract_strided_slice %5 {offsets = [0, 32], sizes = [32, 32], strides = [1, 1]} : vector<32x192xf32> to vector<32x32xf32>
    %12 = arith.truncf %11 : vector<32x32xf32> to vector<32x32xbf16>
    %c0_9 = arith.constant 0 : index
    %c1 = arith.constant 1 : index
    %c0_10 = arith.constant 0 : index
    %c0_11 = arith.constant 0 : index
    %13 = vector.load %arg4[%c0_9, %c1, %c0_10, %c0_11] : memref<2x3x32x32xbf16, #tpu.memory_space<vmem>>, vector<1x1x32x32xbf16>
    %14 = vector.shape_cast %13 : vector<1x1x32x32xbf16> to vector<32x32xbf16>
    %15 = vector.shape_cast %12 : vector<32x32xbf16> to vector<1x1x32x32xbf16>
    tpu.vector_store %arg4[%c0_9, %c1, %c0_10, %c0_11], %15 {strides = array<i32>} : memref<2x3x32x32xbf16, #tpu.memory_space<vmem>>, vector<1x1x32x32xbf16>,
    %16 = vector.extract_strided_slice %5 {offsets = [0, 64], sizes = [32, 32], strides = [1, 1]} : vector<32x192xf32> to vector<32x32xf32>
    %17 = arith.truncf %16 : vector<32x32xf32> to vector<32x32xbf16>
    %c0_12 = arith.constant 0 : index
    %c2 = arith.constant 2 : index
    %c0_13 = arith.constant 0 : index
    %c0_14 = arith.constant 0 : index
    %18 = vector.load %arg4[%c0_12, %c2, %c0_13, %c0_14] : memref<2x3x32x32xbf16, #tpu.memory_space<vmem>>, vector<1x1x32x32xbf16>
    %19 = vector.shape_cast %18 : vector<1x1x32x32xbf16> to vector<32x32xbf16>
    %20 = vector.shape_cast %17 : vector<32x32xbf16> to vector<1x1x32x32xbf16>
    tpu.vector_store %arg4[%c0_12, %c2, %c0_13, %c0_14], %20 {strides = array<i32>} : memref<2x3x32x32xbf16, #tpu.memory_space<vmem>>, vector<1x1x32x32xbf16>,
    %21 = vector.extract_strided_slice %5 {offsets = [0, 96], sizes = [32, 32], strides = [1, 1]} : vector<32x192xf32> to vector<32x32xf32>
    %22 = arith.truncf %21 : vector<32x32xf32> to vector<32x32xbf16>
    %c1_15 = arith.constant 1 : index
    %c0_16 = arith.constant 0 : index
    %c0_17 = arith.constant 0 : index
    %c0_18 = arith.constant 0 : index
    %23 = vector.load %arg4[%c1_15, %c0_16, %c0_17, %c0_18] : memref<2x3x32x32xbf16, #tpu.memory_space<vmem>>, vector<1x1x32x32xbf16>
    %24 = vector.shape_cast %23 : vector<1x1x32x32xbf16> to vector<32x32xbf16>
    %25 = vector.shape_cast %22 : vector<32x32xbf16> to vector<1x1x32x32xbf16>
    tpu.vector_store %arg4[%c1_15, %c0_16, %c0_17, %c0_18], %25 {strides = array<i32>} : memref<2x3x32x32xbf16, #tpu.memory_space<vmem>>, vector<1x1x32x32xbf16>,
    %26 = vector.extract_strided_slice %5 {offsets = [0, 128], sizes = [32, 32], strides = [1, 1]} : vector<32x192xf32> to vector<32x32xf32>
    %27 = arith.truncf %26 : vector<32x32xf32> to vector<32x32xbf16>
    %c1_19 = arith.constant 1 : index
    %c1_20 = arith.constant 1 : index
    %c0_21 = arith.constant 0 : index
    %c0_22 = arith.constant 0 : index
    %28 = vector.load %arg4[%c1_19, %c1_20, %c0_21, %c0_22] : memref<2x3x32x32xbf16, #tpu.memory_space<vmem>>, vector<1x1x32x32xbf16>
    %29 = vector.shape_cast %28 : vector<1x1x32x32xbf16> to vector<32x32xbf16>
    %30 = vector.shape_cast %27 : vector<32x32xbf16> to vector<1x1x32x32xbf16>
    tpu.vector_store %arg4[%c1_19, %c1_20, %c0_21, %c0_22], %30 {strides = array<i32>} : memref<2x3x32x32xbf16, #tpu.memory_space<vmem>>, vector<1x1x32x32xbf16>,
    %31 = vector.extract_strided_slice %5 {offsets = [0, 160], sizes = [32, 32], strides = [1, 1]} : vector<32x192xf32> to vector<32x32xf32>
    %32 = arith.truncf %31 : vector<32x32xf32> to vector<32x32xbf16>
    %c1_23 = arith.constant 1 : index
    %c2_24 = arith.constant 2 : index
    %c0_25 = arith.constant 0 : index
    %c0_26 = arith.constant 0 : index
    %33 = vector.load %arg4[%c1_23, %c2_24, %c0_25, %c0_26] : memref<2x3x32x32xbf16, #tpu.memory_space<vmem>>, vector<1x1x32x32xbf16>
    %34 = vector.shape_cast %33 : vector<1x1x32x32xbf16> to vector<32x32xbf16>
    %35 = vector.shape_cast %32 : vector<32x32xbf16> to vector<1x1x32x32xbf16>
    tpu.vector_store %arg4[%c1_23, %c2_24, %c0_25, %c0_26], %35 {strides = array<i32>} : memref<2x3x32x32xbf16, #tpu.memory_space<vmem>>, vector<1x1x32x32xbf16>,
    return
  }
  func.func @transform_0(%arg0: i32) -> (i32, i32) {
    %c0_i32 = arith.constant 0 : i32
    %c0_i32_0 = arith.constant 0 : i32
    return %arg0, %c0_i32 : i32, i32
  }
  func.func @transform_1(%arg0: i32) -> (i32, i32) {
    %c0_i32 = arith.constant 0 : i32
    %c0_i32_0 = arith.constant 0 : i32
    %c0_i32_1 = arith.constant 0 : i32
    return %c0_i32, %c0_i32_0 : i32, i32
  }
  func.func @transform_2(%arg0: i32) -> (i32, i32) {
    %c0_i32 = arith.constant 0 : i32
    %c0_i32_0 = arith.constant 0 : i32
    %c0_i32_1 = arith.constant 0 : i32
    return %c0_i32, %c0_i32_0 : i32, i32
  }
  func.func @transform_3(%arg0: i32) -> (i32, i32, i32, i32) {
    %c0_i32 = arith.constant 0 : i32
    %c0_i32_0 = arith.constant 0 : i32
    %c0_i32_1 = arith.constant 0 : i32
    %c0_i32_2 = arith.constant 0 : i32
    return %c0_i32, %c0_i32_0, %arg0, %c0_i32_1 : i32, i32, i32, i32
  }
}

</mosaic_0001>

<bundles_post_ra>
// kernel: tpu_custom_call.1
= control target key start
LH: loop header
LB: loop body
LE: loop exit
PB: predicated region body
PF: predicated region fallthrough
CT: control target
= control target key end

     0   :  { %8 = vsyncpa [#allocation3], 0  ;;  %s503_s0 = inlined_call_operand.hbm [shape: bf16[32,32], index: 0, kind: input, shape index: {}]   ;;  %s504_s1 = inlined_call_operand.hbm [shape: bf16[32,192], index: 1, kind: input, shape index: {}]   ;;  %s505_s2 = inlined_call_operand.vmem [shape: f32[1,192], index: 2, kind: input, shape index: {}]   ;;  %s506_s3 = inlined_call_operand.hbm [shape: bf16[2,3,32,32], index: 3, kind: output, shape index: {}]  }
   0x1   :  { %9 = vsyncpa [#allocation6], 0 }
   0x2   :  { %10 = vsyncpa [#allocation4], 0  ;;  %s400_s12 = smov [#allocation2]   ;;  %s328_s16 = scalar_lea.hbm %s503_s0, 256 }
   0x3   :  { %s16_s13 = sshll.u32 %s400_s12, 4  ;;  %p329_p0 = scmp.ne.s32.totalorder %s503_s0, %s328_s16  ;;  %s17_s13 = int_to_ptr.vmem [resolvable:$true] %s16_s13 }
   0x4   :  { %p332_p1 = scmp.lt.u32.totalorder %s328_s16, %s503_s0 }
   0x6   :  { %p334_p2 = pnand %p332_p1, %p329_p0 }
   0x8   :  { %337 = shalt.err (!%p334_p2)
}
   0x9   :  { %s338_s21 = scalar_lea.vmem %s17_s13, 256  ;;  %p343_p4 = scmp.lt.s32.totalorder %s17_s13, %s17_s13 }
   0xa   :  { %p339_p3 = scmp.ne.s32.totalorder %s17_s13, %s338_s21  ;;  %p344_p5 = scmp.lt.s32.totalorder %s338_s21, %s338_s21 }
   0xc   :  { %p345_p6 = por %p344_p5, %p343_p4 }
   0xe   :  { %p346_p7 = pnand %p345_p6, %p339_p3 }
  0x10   :  { %349 = shalt.err (!%p346_p7)
}
  0x11   :  { %s401_s22 = smov 64   ;;  %s402_s23 = smov 4  }
  0x12   :  { %22 = dma.hbm_to_vmem [thread:$0]  %s503_s0, 256, %s17_s13, [#allocation3], %s401_s22, %s401_s22, %s402_s23  }
  0x13   :  { %s403_s26 = smov [#allocation5]   ;;  %s350_s30 = scalar_lea.hbm %s504_s1, 512 }
  0x14   :  { %s28_s27 = sshll.u32 %s403_s26, 4  ;;  %p351_p8 = scmp.ne.s32.totalorder %s504_s1, %s350_s30  ;;  %s29_s27 = int_to_ptr.vmem [resolvable:$true] %s28_s27 }
  0x15   :  { %p354_p9 = scmp.lt.u32.totalorder %s350_s30, %s504_s1 }
  0x17   :  { %p356_p10 = pnand %p354_p9, %p351_p8 }
  0x19   :  { %359 = shalt.err (!%p356_p10)
}
  0x1a   :  { %s360_s8 = scalar_lea.vmem %s29_s27, 512  ;;  %p365_p12 = scmp.lt.s32.totalorder %s29_s27, %s29_s27 }
  0x1b   :  { %p361_p11 = scmp.ne.s32.totalorder %s29_s27, %s360_s8  ;;  %p366_p13 = scmp.lt.s32.totalorder %s360_s8, %s360_s8 }
  0x1d   :  { %p367_p0 = por %p366_p13, %p365_p12 }
  0x1f   :  { %p368_p1 = pnand %p367_p0, %p361_p11 }
  0x21   :  { %371 = shalt.err (!%p368_p1)
}
  0x22   :  { %s404_s0 = smov 128   ;;  %s405_s9 = smov 8  }
  0x23   :  { %34 = dma.hbm_to_vmem [thread:$0]  %s504_s1, 512, %s29_s27, [#allocation6], %s404_s0, %s404_s0, %s405_s9  }
  0x24   :  { %394 = dma.done.wait [#allocation3], 256  }
  0x25   :  { %395 = vsyncadd [#allocation3], 4294967040 }
  0x26   :  { %396 = dma.done.wait [#allocation6], 512  }
  0x27   :  { %397 = vsyncadd [#allocation6], 4294966784  ;;  %v406_v0 = vmov 0   ;;  %v320_v1 = vld [vmem:[#allocation5 + $0x4] ss:$8 sps:$4 sm:$0xff]   ;;  %v326_v5 = vld [vmem:[#allocation2] sm:$0xff]   ;;  %v54_v7 = vlaneseq }
  0x28   :  { %133 = vmatprep.mubr.bf16.mxu0 %v406_v0  ;;  %143 = vmatprep.mubr.bf16.mxu1 %v406_v0  ;;  %v322_v2 = vld [vmem:[#allocation5] ss:$8 sps:$4 sm:$0xff]   ;;  %v323_v3 = vld [vmem:[#allocation5 + $0x14] ss:$8 sps:$4 sm:$0xff]   ;;  %v325_v4 = vld [vmem:[#allocation5 + $0x10] ss:$8 sps:$4 sm:$0xff]  }
  0x29   :  { %101 = vmatprep.subr.bf16.mxu0 %v320_v1  ;;  %306 = vmatprep.subr.bf16.mxu1 %v320_v1  ;;  %v327_v6 = vld [vmem:[#allocation2 + $0x8] sm:$0xff]   ;;  %vm94_vm0 = vcmask 261120   ;;  %v55_v8 = vshrl.u32 %v54_v7, 7  ;;  %v52_v10 = vld [vmem:[%s505_s2] sm:$0x3]  ;;  %vm170_vm1 = vcmask 257024  }
  0x2a   :  { %102 = vmatpush1.bf16.msra.mxu0 %v322_v2  ;;  %308 = vmatpush1.bf16.msra.mxu1 %v322_v2  ;;  %s407_s2 = smov 96   ;;  %s408_s13 = smov 32  }
  0x2b   :  { %103 = vmatprep.subr.bf16.mxu0 %v323_v3  ;;  %307 = vmatprep.subr.bf16.mxu1 %v323_v3  ;;  %v56_v9 = vsub.s32 0, %v55_v8  ;;  %v60_v11 = vsub.s32 1, %v55_v8  ;;  %s409_s14 = smov [#allocation7]  }
  0x2c   :  { %s269_s15 = sshll.u32 %s409_s14, 4  ;;  %s270_s15 = int_to_ptr.vmem [resolvable:$true] %s269_s15 }
  0x2d   :  { %v57_v12 = vrot.slane %v52_v10, %v56_v9  ;;  %v61_v13 = vrot.slane %v52_v10, %v60_v11  ;;  %s372_s16 = scalar_lea.vmem %s270_s15, 1536  ;;  %p377_p3 = scmp.lt.s32.totalorder %s270_s15, %s270_s15 }
  0x2e   :  { %104 = vmatpush1.bf16.msra.mxu0 %v325_v4  ;;  %309 = vmatpush1.bf16.msra.mxu1 %v325_v4  ;;  %p373_p2 = scmp.ne.s32.totalorder %s270_s15, %s372_s16  ;;  %p378_p4 = scmp.lt.s32.totalorder %s372_s16, %s372_s16 }
  0x30   :  { %p379_p5 = por %p378_p4, %p377_p3 }
  0x31   :  { %288 = vmatmul.mubr.msk.bf16.vlgmr.msra.gmra.mrb[0].mxu0 %vm94_vm0, %v326_v5  ;;  %289 = vmatmul.mubr.msk.bf16.vlgmr.msra.gmra.mrb[0].mxu1 %vm94_vm0, %v327_v6 }
  0x32   :  { %p380_p6 = pnand %p379_p5, %p373_p2 }
 0x104   :  { %v135_v14 = vpop.f32.mrb[0].mxu0  ;;  %v145_v15 = vpop.f32.mrb[0].mxu1 }
 0x105   :  { %v136_v16 = vadd.f32 %v135_v14, %v57_v12  ;;  %v146_v17 = vadd.f32 %v145_v15, %v57_v12  ;;  %v137_v18 = vpop.f32.mrb[1].mxu0  ;;  %v147_v19 = vpop.f32.mrb[1].mxu1 }
 0x106   :  { %v138_v20 = vadd.f32 %v137_v18, %v61_v13  ;;  %v148_v21 = vadd.f32 %v147_v19, %v61_v13  ;;  %v139_v22 = vpop.f32.mrb[2].mxu0  ;;  %v149_v23 = vpop.f32.mrb[2].mxu1 }
 0x107   :  { %v298_v24 = vpack.c.bf16 %v136_v16, %v136_v16  ;;  %v300_v25 = vpack.c.bf16 %v146_v17, %v146_v17  ;;  %v140_v26 = vadd.f32 %v139_v22, %v57_v12  ;;  %v150_v27 = vadd.f32 %v149_v23, %v57_v12  ;;  %v141_v28 = vpop.f32.mrb[3].mxu0  ;;  %v151_v29 = vpop.f32.mrb[3].mxu1 }
 0x108   :  { %v302_v30 = vpack.c.bf16 %v138_v20, %v138_v20  ;;  %v304_v31 = vpack.c.bf16 %v148_v21, %v148_v21  ;;  %v142_v32 = vadd.f32 %v141_v28, %v61_v13  ;;  %v152_v33 = vadd.f32 %v151_v29, %v61_v13 }
 0x109   :  { %171 = vst.msk [vmem:[#allocation7] sm:$0xf] %vm170_vm1, %v298_v24  ;;  %173 = vst.msk [vmem:[#allocation7 + $0x8] sm:$0xf] %vm170_vm1, %v300_v25  ;;  %v299_v34 = vpack.c.bf16 %v140_v26, %v140_v26  ;;  %v301_v35 = vpack.c.bf16 %v150_v27, %v150_v27  ;;  %179 = vrot.lane.b32.xlu1 %v300_v25, %s407_s2  ;;  %175 = vrot.lane.b32.xlu0 %v298_v24, %s407_s2 }
 0x10a   :  { %243 = vst.msk [vmem:[#allocation7 + $0x40] sm:$0xf] %vm170_vm1, %v302_v30  ;;  %245 = vst.msk [vmem:[#allocation7 + $0x48] sm:$0xf] %vm170_vm1, %v304_v31  ;;  %v303_v36 = vpack.c.bf16 %v142_v32, %v142_v32  ;;  %v305_v37 = vpack.c.bf16 %v152_v33, %v152_v33 }
 0x10b   :  { %172 = vst.msk [vmem:[#allocation7 + $0x4] sm:$0xf] %vm170_vm1, %v299_v34  ;;  %174 = vst.msk [vmem:[#allocation7 + $0xc] sm:$0xf] %vm170_vm1, %v301_v35 }
 0x10c   :  { %244 = vst.msk [vmem:[#allocation7 + $0x44] sm:$0xf] %vm170_vm1, %v303_v36  ;;  %246 = vst.msk [vmem:[#allocation7 + $0x4c] sm:$0xf] %vm170_vm1, %v305_v37 }
 0x10d   :  { %181 = vrot.lane.b32.xlu1 %v301_v35, %s407_s2  ;;  %192 = vrot.lane.b32.xlu0 %v298_v24, %s401_s22 }
 0x111   :  { %194 = vrot.lane.b32.xlu1 %v299_v34, %s401_s22  ;;  %196 = vrot.lane.b32.xlu0 %v300_v25, %s401_s22 }
 0x115   :  { %198 = vrot.lane.b32.xlu1 %v301_v35, %s401_s22  ;;  %209 = vrot.lane.b32.xlu0 %v298_v24, %s408_s13 }
 0x119   :  { %211 = vrot.lane.b32.xlu1 %v299_v34, %s408_s13  ;;  %213 = vrot.lane.b32.xlu0 %v300_v25, %s408_s13 }
 0x11d   :  { %215 = vrot.lane.b32.xlu1 %v301_v35, %s408_s13  ;;  %247 = vrot.lane.b32.xlu0 %v302_v30, %s407_s2 }
 0x121   :  { %249 = vrot.lane.b32.xlu1 %v303_v36, %s407_s2  ;;  %177 = vrot.lane.b32.xlu0 %v299_v34, %s407_s2 }
 0x125   :  { %253 = vrot.lane.b32.xlu1 %v305_v37, %s407_s2  ;;  %251 = vrot.lane.b32.xlu0 %v304_v31, %s407_s2 }
 0x17b   :  { %v180_v38 = vpop.permute.xlu1 %179  ;;  %v176_v39 = vpop.permute.xlu0 %175 }
 0x17c   :  { %190 = vst.msk [vmem:[#allocation7 + $0x18] sm:$0xf] %vm170_vm1, %v180_v38  ;;  %188 = vst.msk [vmem:[#allocation7 + $0x10] sm:$0xf] %vm170_vm1, %v176_v39 }
 0x17f   :  { %v182_v40 = vpop.permute.xlu1 %181  ;;  %v193_v41 = vpop.permute.xlu0 %192 }
 0x180   :  { %191 = vst.msk [vmem:[#allocation7 + $0x1c] sm:$0xf] %vm170_vm1, %v182_v40  ;;  %205 = vst.msk [vmem:[#allocation7 + $0x20] sm:$0xf] %vm170_vm1, %v193_v41 }
 0x183   :  { %v195_v42 = vpop.permute.xlu1 %194  ;;  %v197_v43 = vpop.permute.xlu0 %196 }
 0x184   :  { %206 = vst.msk [vmem:[#allocation7 + $0x24] sm:$0xf] %vm170_vm1, %v195_v42  ;;  %207 = vst.msk [vmem:[#allocation7 + $0x28] sm:$0xf] %vm170_vm1, %v197_v43 }
 0x187   :  { %v199_v44 = vpop.permute.xlu1 %198  ;;  %v210_v45 = vpop.permute.xlu0 %209 }
 0x188   :  { %208 = vst.msk [vmem:[#allocation7 + $0x2c] sm:$0xf] %vm170_vm1, %v199_v44  ;;  %222 = vst.msk [vmem:[#allocation7 + $0x30] sm:$0xf] %vm170_vm1, %v210_v45 }
 0x18b   :  { %v212_v46 = vpop.permute.xlu1 %211  ;;  %v214_v47 = vpop.permute.xlu0 %213 }
 0x18c   :  { %223 = vst.msk [vmem:[#allocation7 + $0x34] sm:$0xf] %vm170_vm1, %v212_v46  ;;  %224 = vst.msk [vmem:[#allocation7 + $0x38] sm:$0xf] %vm170_vm1, %v214_v47 }
 0x18f   :  { %v216_v48 = vpop.permute.xlu1 %215  ;;  %v248_v49 = vpop.permute.xlu0 %247 }
 0x190   :  { %225 = vst.msk [vmem:[#allocation7 + $0x3c] sm:$0xf] %vm170_vm1, %v216_v48  ;;  %260 = vst.msk [vmem:[#allocation7 + $0x50] sm:$0xf] %vm170_vm1, %v248_v49 }
 0x193   :  { %v250_v50 = vpop.permute.xlu1 %249  ;;  %v178_v51 = vpop.permute.xlu0 %177 }
 0x194   :  { %261 = vst.msk [vmem:[#allocation7 + $0x54] sm:$0xf] %vm170_vm1, %v250_v50  ;;  %189 = vst.msk [vmem:[#allocation7 + $0x14] sm:$0xf] %vm170_vm1, %v178_v51 }
 0x197   :  { %v254_v52 = vpop.permute.xlu1 %253  ;;  %v252_v53 = vpop.permute.xlu0 %251 }
 0x198   :  { %263 = vst.msk [vmem:[#allocation7 + $0x5c] sm:$0xf] %vm170_vm1, %v254_v52  ;;  %262 = vst.msk [vmem:[#allocation7 + $0x58] sm:$0xf] %vm170_vm1, %v252_v53 }
 0x199   :  { %383 = shalt.err (!%p380_p6)
}
 0x19a   :  { %s384_s19 = scalar_lea.hbm %s506_s3, 1536 }
 0x19b   :  { %p385_p7 = scmp.ne.s32.totalorder %s506_s3, %s384_s19  ;;  %p388_p8 = scmp.lt.u32.totalorder %s384_s19, %s506_s3 }
 0x19d   :  { %p390_p9 = pnand %p388_p8, %p385_p7 }
 0x19f   :  { %393 = shalt.err (!%p390_p9)
}
 0x1a0   :  { %275 = dma.vmem_to_hbm [thread:$0]  %s270_s15, 1536, %s506_s3, [#allocation4], %s401_s22, %s401_s22, %s402_s23  }
 0x1a1   :  { %398 = dma.done.wait [#allocation4], 1536  }
 0x1a2   :  { %399 = vsyncadd [#allocation4], 4294965760 }
 0x1a3   :  { %279 = vsyncpa [#allocation3], 1 }
 0x1a4   :  { %280 = vsyncpa [#allocation6], 1 }
 0x1a5   :  { %281 = vsyncpa [#allocation4], 1 }

</bundles_post_ra>
